<compile_context>
chip_gen: v5e
topology: v5e:2x2
jax: 0.10.0
libtpu: 0.0.40
codegen_flags: <defaults>
</compile_context>

<pallas_src>
import math
import functools

import jax
import jax.numpy as jnp
from jax.experimental import pallas as pl
from jax.experimental.pallas import tpu as pltpu


def aaca_hyperparams(channel, gamma=2, q=1, lamda=2, m=1):
    """Replicates the kernel-size / dilation / padding math from aaca_layer.__init__."""
    t = int(abs((math.log(channel, 2) + q) / gamma))
    k = t if t % 2 else t - 1
    if k < 1:
        raise ValueError(f"aaca_layer: derived kernel_size={k} < 1 for channel={channel}")
    r = int((k + m) / lamda)
    pad = int((k - 1) * r / 2)
    return k, r, pad


def _round_up(a, m):
    return (a + m - 1) // m * m


def _dilated_toeplitz(w_1d, c, K, R, PAD):
    """(c, c) matrix T with (T @ v)[i] == Conv1d(1,1,K,dilation=R,padding=PAD,bias=False)(v)[i]."""
    i = jnp.arange(c)[:, None]
    j = jnp.arange(c)[None, :]
    T = jnp.zeros((c, c), jnp.float32)
    for k in range(K):
        T = T + w_1d[k] * (j == (i + k * R - PAD)).astype(jnp.float32)
    return T


def _attention_from_mean(mean_col, t1t, t2):
    """mean_col: (C, 1) f32 channel means.  t1t = T1^T, t2 = T2, both (C, C) f32.

    Returns sigmoid(conv2(relu(conv1(mean)))) as a (C, 1) f32 column.  Everything stays
    in its natural layout (no transposes/relayouts); exact f32 on the VPU/XLU/EUP.
    """
    y = jnp.sum(t1t * mean_col, axis=0, keepdims=True)   # (1, C): conv #1
    y = jnp.maximum(y, 0.0)                              # ReLU
    y = jnp.sum(t2 * y, axis=1, keepdims=True)           # (C, 1): conv #2
    return 1.0 / (1.0 + jnp.exp(-y))                     # Sigmoid


# ----------------------------- kernels ---------------------------------------------


def _fused_kernel(x_ref, t1t_ref, t2_ref, o_ref, *, inv_hw):
    # x_ref / o_ref: (1, C, HW) full per-batch slab resident in VMEM (read once, write once).
    x = x_ref[...].astype(jnp.float32)
    mean_col = (jnp.sum(x, axis=2, keepdims=True) * inv_hw)[0]       # (C, 1)
    y = _attention_from_mean(mean_col, t1t_ref[...], t2_ref[...])    # (C, 1)
    o_ref[...] = (x * y[None]).astype(o_ref.dtype)


def _reduce_attn_kernel(x_ref, t1t_ref, t2_ref, attn_ref, acc_ref, *,
                        hw, t_hw, inv_hw, mask_tail):
    # x_ref   : (1, C, T_HW) tile of x
    # attn_ref: (1, C, 1) output block, resident across the HW-tile axis
    # acc_ref : (1, C, 128) f32 scratch of lane-partial sums
    ti = pl.program_id(1)
    c = acc_ref.shape[1]

    @pl.when(ti == 0)
    def _init():
        acc_ref[...] = jnp.zeros_like(acc_ref)

    if mask_tail:
        lane = jax.lax.broadcasted_iota(jnp.int32, (1, c, 128), 2)
        limit = hw - ti * t_hw          # number of valid lanes in this tile

    # VPU-only accumulation: fold 128-lane columns; the single XLU reduce is in finalize.
    partial = jnp.zeros((1, c, 128), jnp.float32)
    for j in range(t_hw // 128):
        v = x_ref[:, :, j * 128:(j + 1) * 128].astype(jnp.float32)
        if mask_tail:
            v = jnp.where(lane < (limit - j * 128), v, 0.0)
        partial = partial + v
    acc_ref[...] += partial

    @pl.when(ti == pl.num_programs(1) - 1)
    def _finalize():
        # AdaptiveAvgPool2d(1): divide by the true H*W (masked lanes contribute zero).
        mean_col = (jnp.sum(acc_ref[...], axis=2, keepdims=True) * inv_hw)[0]   # (C, 1)
        attn_ref[...] = _attention_from_mean(mean_col, t1t_ref[...], t2_ref[...])[None]


def _apply_attn_kernel(x_ref, attn_ref, o_ref):
    # (1, C, T_HW) * (1, C, 1): lane-broadcast multiply; OOB lanes of a ragged last tile
    # are masked by Pallas on store.
    o_ref[...] = (x_ref[...].astype(jnp.float32) * attn_ref[...]).astype(o_ref.dtype)


# ----------------------------- wrapper ----------------------------------------------


def aaca_forward(x, w1, w2, gamma=2, q=1, lamda=2, m=1, *,
                 force_two_pass=False, target_block_bytes=None):
    """x: (B, C, H, W); w1, w2: (1, 1, K) Conv1d weights (bias=False)."""
    b, c, h, w = x.shape
    K, R, PAD = aaca_hyperparams(c, gamma, q, lamda, m)
    assert w1.shape == (1, 1, K) and w2.shape == (1, 1, K)
    # 'same'-length conv so the attention vector broadcasts back over channels.
    assert 2 * PAD == R * (K - 1), "padding does not preserve channel length"

    hw = h * w
    itemsize = jnp.dtype(x.dtype).itemsize
    x3 = x.reshape(b, c, hw)            # free reshape (same layout), no copy

    # Dilated conv as (C, C) Toeplitz matrices (exact f32, contracted on the VPU).
    # TODO(synk): for very wide C (>~2048) switch back to a K-tap shift-add conv to avoid
    # the O(C^2) weight footprint, and tile the channel axis of the streaming passes.
    t1t = _dilated_toeplitz(w1.reshape(K).astype(jnp.float32), c, K, R, PAD).T
    t2 = _dilated_toeplitz(w2.reshape(K).astype(jnp.float32), c, K, R, PAD)

    # Generation-aware VMEM budgeting (64 MiB on v7x, 128 MiB on v5e/v6e).
    try:
        vmem_cap = int(pltpu.get_tpu_info().vmem_capacity_bytes)
    except Exception:
        vmem_cap = 64 * 1024 * 1024     # conservative: v7x has the smallest VMEM
    vmem_budget = (vmem_cap * 3) // 4

    w_bytes = 2 * 2 * c * c * 4         # two (C, C) f32 weight mats, double-buffered

    # ---------- fused single-pass path: read x once, write x once ----------
    sub_mult = 8 * max(1, 4 // itemsize)            # sublane tile (dtype packing)
    hw_pad = _round_up(hw, 128)
    slab_in = _round_up(c, sub_mult) * hw_pad * itemsize
    slab_f32 = _round_up(c, 8) * hw_pad * 4
    fused_need = 4 * slab_in + 3 * slab_f32 + w_bytes + (2 << 20)   # bufs + f32 temps

    if (not force_two_pass) and fused_need <= vmem_budget:
        out3 = pl.pallas_call(
            functools.partial(_fused_kernel, inv_hw=1.0 / float(hw)),
            out_shape=jax.ShapeDtypeStruct((b, c, hw), x.dtype),
            grid=(b,),
            in_specs=[
                pl.BlockSpec((1, c, hw), lambda bi: (bi, 0, 0)),
                pl.BlockSpec((c, c), lambda bi: (0, 0)),
                pl.BlockSpec((c, c), lambda bi: (0, 0)),
            ],
            out_specs=pl.BlockSpec((1, c, hw), lambda bi: (bi, 0, 0)),
            compiler_params=pltpu.CompilerParams(
                dimension_semantics=("parallel",),
                vmem_limit_bytes=vmem_budget),
        )(x3, t1t, t2)
        return out3.reshape(b, c, h, w)

    # ---------- two-pass tiled path (no padding, ragged last tile) ----------
    if target_block_bytes is None:
        # ~4 MiB tiles on v7x, ~8 MiB on v5e/v6e (amortize the ~0.35us per-step cost).
        target_block_bytes = max(2 << 20, vmem_cap // 16)
    t_hw = (target_block_bytes // (c * itemsize)) // 128 * 128
    t_hw = max(128, min(t_hw, 32768, _round_up(hw, 128)))
    n_t = pl.cdiv(hw, t_hw)
    block_bytes = c * t_hw * itemsize
    mask_tail = (hw % t_hw) != 0

    limit1 = min(vmem_budget, max(32 << 20, 3 * block_bytes + w_bytes + (4 << 20)))
    limit2 = min(vmem_budget, max(32 << 20, 5 * block_bytes + (4 << 20)))

    # Pass 1: channel means + conv/ReLU/conv/sigmoid -> (B, C, 1) attention (f32).
    # TODO(synk): when B == 1 on v7x, split the HW axis into a leading 'parallel' chunk
    # axis (partial sums + tiny combine) so both TensorCores share pass-1 traffic.
    reduce_kernel = functools.partial(
        _reduce_attn_kernel, hw=hw, t_hw=t_hw, inv_hw=1.0 / float(hw), mask_tail=mask_tail)
    attn = pl.pallas_call(
        reduce_kernel,
        out_shape=jax.ShapeDtypeStruct((b, c, 1), jnp.float32),
        grid=(b, n_t),
        in_specs=[
            pl.BlockSpec((1, c, t_hw), lambda bi, ti: (bi, 0, ti)),
            pl.BlockSpec((c, c), lambda bi, ti: (0, 0)),
            pl.BlockSpec((c, c), lambda bi, ti: (0, 0)),
        ],
        out_specs=pl.BlockSpec((1, c, 1), lambda bi, ti: (bi, 0, 0)),
        scratch_shapes=[pltpu.VMEM((1, c, 128), jnp.float32)],
        compiler_params=pltpu.CompilerParams(
            dimension_semantics=("parallel", "arbitrary"),
            vmem_limit_bytes=limit1),
    )(x3, t1t, t2)

    # Pass 2: broadcast multiply over lane-dense HW tiles; fully parallel for megacore.
    out3 = pl.pallas_call(
        _apply_attn_kernel,
        out_shape=jax.ShapeDtypeStruct((b, c, hw), x.dtype),
        grid=(b, n_t),
        in_specs=[
            pl.BlockSpec((1, c, t_hw), lambda bi, ti: (bi, 0, ti)),
            pl.BlockSpec((1, c, 1), lambda bi, ti: (bi, 0, 0)),
        ],
        out_specs=pl.BlockSpec((1, c, t_hw), lambda bi, ti: (bi, 0, ti)),
        compiler_params=pltpu.CompilerParams(
            dimension_semantics=("parallel", "parallel"),
            vmem_limit_bytes=limit2),
    )(x3, attn)
    return out3.reshape(b, c, h, w)


# ----------------------------- reference & test --------------------------------------


def aaca_reference(x, w1, w2, gamma=2, q=1, lamda=2, m=1):
    """Pure-JAX reference matching the PyTorch forward exactly."""
    b, c, h, w = x.shape
    K, R, PAD = aaca_hyperparams(c, gamma, q, lamda, m)
    y = x.mean(axis=(2, 3))            # (b, c)  == AdaptiveAvgPool2d(1) + squeeze
    yy = y[:, None, :]                 # (b, 1, c) == squeeze(-1).transpose(-1, -2)

    def conv(v, wk):
        return jax.lax.conv_general_dilated(
            v, wk.reshape(1, 1, K).astype(jnp.float32),
            window_strides=(1,), padding=[(PAD, PAD)],
            rhs_dilation=(R,),
            dimension_numbers=("NCH", "OIH", "NCH"))

    yy = conv(yy, w1)
    yy = jax.nn.relu(yy)
    yy = conv(yy, w2)
    yy = jax.nn.sigmoid(yy)
    return x * yy[:, 0, :, None, None]


if __name__ == "__main__":
    # channel=32 -> non-trivial Conv1d: kernel_size=3, dilation=2, padding=2.
    B, C, H, W = 2, 32, 16, 16
    K, _, _ = aaca_hyperparams(C)

    key = jax.random.PRNGKey(0)
    kx, k1, k2, kx2 = jax.random.split(key, 4)
    x = jax.random.normal(kx, (B, C, H, W), dtype=jnp.float32)
    bound = 1.0 / math.sqrt(K)         # PyTorch default uniform bound for Conv1d(1, 1, K)
    w1 = jax.random.uniform(k1, (1, 1, K), jnp.float32, -bound, bound)
    w2 = jax.random.uniform(k2, (1, 1, K), jnp.float32, -bound, bound)

    # 1) Fused single-pass path (per-batch slab fits in VMEM).
    out = jax.block_until_ready(aaca_forward(x, w1, w2))
    ref = jax.block_until_ready(aaca_reference(x, w1, w2))
    assert out.shape == x.shape
    assert jnp.max(jnp.abs(out - ref)) < 1e-5, "fused path mismatch vs reference"

    # 2) Two-pass tiled path with a non-128-multiple HW: exercises tail-lane masking in
    #    the reduce kernel and masked OOB stores of the ragged last tile in the apply pass.
    H2, W2 = 20, 20                    # hw = 400 -> 128-lane tiles, ragged last tile
    x2 = jax.random.normal(kx2, (B, C, H2, W2), dtype=jnp.float32)
    out2 = jax.block_until_ready(
        aaca_forward(x2, w1, w2, force_two_pass=True, target_block_bytes=128 * C * 4))
    ref2 = jax.block_until_ready(aaca_reference(x2, w1, w2))
    assert out2.shape == x2.shape
    assert jnp.max(jnp.abs(out2 - ref2)) < 1e-5, "tiled path mismatch vs reference"

    print("KERNEL_OK")
</pallas_src>

<mosaic_0001>
module attributes {stable_mosaic.version = 11 : i64} {
  func.func @_fused_kernel(%arg0: i32, %arg1: memref<1x32x256xf32, #tpu.memory_space<vmem>>, %arg2: memref<32x32xf32, #tpu.memory_space<vmem>>, %arg3: memref<32x32xf32, #tpu.memory_space<vmem>>, %arg4: memref<1x32x256xf32, #tpu.memory_space<vmem>>) attributes {dimension_semantics = [#tpu.dimension_semantics<parallel>], iteration_bounds = array<i64: 2>, scalar_prefetch = 0 : i64, scratch_operands = 0 : i64, tpu.core_type = #tpu.core_type<tc>, window_params = [{transform_indices = @transform_0, window_bounds = array<i64: 1, 32, 256>}, {pipeline_mode = #tpu.pipeline_mode<synchronous>, transform_indices = @transform_1, window_bounds = array<i64: 32, 32>}, {pipeline_mode = #tpu.pipeline_mode<synchronous>, transform_indices = @transform_2, window_bounds = array<i64: 32, 32>}, {transform_indices = @transform_3, window_bounds = array<i64: 1, 32, 256>}]} {
    %c0 = arith.constant 0 : index
    %c0_0 = arith.constant 0 : index
    %c0_1 = arith.constant 0 : index
    %0 = vector.load %arg1[%c0, %c0_0, %c0_1] : memref<1x32x256xf32, #tpu.memory_space<vmem>>, vector<1x32x256xf32>
    %cst = arith.constant dense<0.000000e+00> : vector<1x32xf32>
    %1 = vector.multi_reduction <add>, %0, %cst [2] : vector<1x32x256xf32> to vector<1x32xf32>
    %2 = vector.shape_cast %1 : vector<1x32xf32> to vector<1x32x1xf32>
    %cst_2 = arith.constant 3.906250e-03 : f32
    %3 = vector.broadcast %cst_2 : f32 to vector<1x32x1xf32>
    %4 = arith.mulf %2, %3 : vector<1x32x1xf32>
    %5 = vector.shape_cast %4 : vector<1x32x1xf32> to vector<32x1xf32>
    %c0_3 = arith.constant 0 : index
    %c0_4 = arith.constant 0 : index
    %6 = vector.load %arg2[%c0_3, %c0_4] : memref<32x32xf32, #tpu.memory_space<vmem>>, vector<32x32xf32>
    %c0_5 = arith.constant 0 : index
    %c0_6 = arith.constant 0 : index
    %7 = vector.load %arg3[%c0_5, %c0_6] : memref<32x32xf32, #tpu.memory_space<vmem>>, vector<32x32xf32>
    %8 = vector.broadcast %5 : vector<32x1xf32> to vector<32x32xf32>
    %9 = arith.mulf %6, %8 : vector<32x32xf32>
    %cst_7 = arith.constant dense<0.000000e+00> : vector<32xf32>
    %10 = vector.multi_reduction <add>, %9, %cst_7 [0] : vector<32x32xf32> to vector<32xf32>
    %11 = vector.shape_cast %10 : vector<32xf32> to vector<1x32xf32>
    %cst_8 = arith.constant 0.000000e+00 : f32
    %12 = vector.broadcast %cst_8 : f32 to vector<1x32xf32>
    %13 = arith.maximumf %11, %12 : vector<1x32xf32>
    %14 = vector.broadcast %13 : vector<1x32xf32> to vector<32x32xf32>
    %15 = arith.mulf %7, %14 : vector<32x32xf32>
    %cst_9 = arith.constant dense<0.000000e+00> : vector<32xf32>
    %16 = vector.multi_reduction <add>, %15, %cst_9 [1] : vector<32x32xf32> to vector<32xf32>
    %17 = vector.shape_cast %16 : vector<32xf32> to vector<32x1xf32>
    %cst_10 = arith.constant 0.000000e+00 : f32
    %18 = vector.broadcast %cst_10 : f32 to vector<32x1xf32>
    %19 = arith.subf %18, %17 : vector<32x1xf32>
    %20 = math.exp %19 : vector<32x1xf32>
    %cst_11 = arith.constant 1.000000e+00 : f32
    %21 = vector.broadcast %cst_11 : f32 to vector<32x1xf32>
    %22 = arith.addf %21, %20 : vector<32x1xf32>
    %cst_12 = arith.constant 1.000000e+00 : f32
    %23 = vector.broadcast %cst_12 : f32 to vector<32x1xf32>
    %24 = arith.divf %23, %22 : vector<32x1xf32>
    %25 = vector.shape_cast %24 : vector<32x1xf32> to vector<1x32x1xf32>
    %26 = vector.broadcast %25 : vector<1x32x1xf32> to vector<1x32x256xf32>
    %27 = arith.mulf %0, %26 : vector<1x32x256xf32>
    %c0_13 = arith.constant 0 : index
    %c0_14 = arith.constant 0 : index
    %c0_15 = arith.constant 0 : index
    %28 = vector.load %arg4[%c0_13, %c0_14, %c0_15] : memref<1x32x256xf32, #tpu.memory_space<vmem>>, vector<1x32x256xf32>
    tpu.vector_store %arg4[%c0_13, %c0_14, %c0_15], %27 {strides = array<i32>} : memref<1x32x256xf32, #tpu.memory_space<vmem>>, vector<1x32x256xf32>,
    return
  }
  func.func @transform_0(%arg0: i32) -> (i32, i32, i32) {
    %c0_i32 = arith.constant 0 : i32
    %c0_i32_0 = arith.constant 0 : i32
    %c0_i32_1 = arith.constant 0 : i32
    return %arg0, %c0_i32, %c0_i32_0 : i32, i32, i32
  }
  func.func @transform_1(%arg0: i32) -> (i32, i32) {
    %c0_i32 = arith.constant 0 : i32
    %c0_i32_0 = arith.constant 0 : i32
    %c0_i32_1 = arith.constant 0 : i32
    return %c0_i32, %c0_i32_0 : i32, i32
  }
  func.func @transform_2(%arg0: i32) -> (i32, i32) {
    %c0_i32 = arith.constant 0 : i32
    %c0_i32_0 = arith.constant 0 : i32
    %c0_i32_1 = arith.constant 0 : i32
    return %c0_i32, %c0_i32_0 : i32, i32
  }
  func.func @transform_3(%arg0: i32) -> (i32, i32, i32) {
    %c0_i32 = arith.constant 0 : i32
    %c0_i32_0 = arith.constant 0 : i32
    %c0_i32_1 = arith.constant 0 : i32
    return %arg0, %c0_i32, %c0_i32_0 : i32, i32, i32
  }
}

</mosaic_0001>

<bundles_post_ra>
// kernel: tpu_custom_call.1
= control target key start
LH: loop header
LB: loop body
LE: loop exit
PB: predicated region body
PF: predicated region fallthrough
CT: control target
= control target key end

     0   :  { %8 = vsyncpa [#allocation3], 0  ;;  %s993_s0 = inlined_call_operand.hbm [shape: f32[2,32,256], index: 0, kind: input, shape index: {}]   ;;  %s994_s1 = inlined_call_operand.hbm [shape: f32[32,32], index: 1, kind: input, shape index: {}]   ;;  %s995_s2 = inlined_call_operand.hbm [shape: f32[32,32], index: 2, kind: input, shape index: {}]   ;;  %s996_s3 = inlined_call_operand.hbm [shape: f32[2,32,256], index: 3, kind: output, shape index: {}]  }
   0x1   :  { %10 = vsyncpa [#allocation3 + $0x1], 0 }
   0x2   :  { %11 = vsyncpa [#allocation6], 0 }
   0x3   :  { %12 = vsyncpa [#allocation4], 0 }
   0x4   :  { %14 = vsyncpa [#allocation4 + $0x1], 0  ;;  %s790_s12 = smov 0   ;;  %s792_s13 = smov 0  }
   0x5   :  { %s794_s14 = smov 0   ;;  %s796_s15 = smov 0  }
   0x6 LB: > { %s811_s16 = sadd.s32 4294967295, %s760_s15   ;;  %s491_s17 = sadd.s32 4294967294, %s760_s15   ;;  %s760_s15 = sphi %s796_s15, %s1006_s15   ;;  %s756_s14 = sphi %s794_s14, %s1005_s14   ;;  %s752_s13 = sphi %s792_s13, %s1004_s13   ;;  %s748_s12 = sphi %s790_s12, %s1003_s12  }
   0x7   : > { %p40_p0 = scmp.ne.s32.totalorder %s752_s13, %s748_s12  ;;  %p41_p1 = scmp.eq.s32.totalorder %s811_s16, 0 }
   0x8   : > { %p106_p2 = scmp.eq.s32.totalorder %s811_s16, 1  ;;  %p112_p3 = scmp.eq.s32.totalorder %s491_s17, 1 }
   0x9   : > { %p820_p4 = por %p41_p1, %p40_p0  ;;  %p492_p5 = scmp.ge.s32.totalorder %s760_s15, 1 }
   0xa   : > { %p825_p6 = por %p112_p3, %p40_p0  ;;  %p119_p7 = scmp.lt.s32.totalorder %s760_s15, 3 }
   0xb   : > { %s130_s22 = sshll.u32 %s994_s1, 4  ;;  %s762_s24 = smov [#allocation5]   ;;  %s131_s22 = int_to_ptr.hbm [resolvable:$true] %s130_s22 }
   0xc   : > { %p833_p8 = pnand %p492_p5, %p119_p7  ;;  %s132_s25 = sshll.u32 %s762_s24, 4  ;;  %s133_s25 = int_to_ptr.vmem [resolvable:$true] %s132_s25 }
   0xd   : > { %s144_s28 = sshll.u32 %s995_s2, 4  ;;  %s763_s29 = smov 128   ;;  %s145_s28 = int_to_ptr.hbm [resolvable:$true] %s144_s28 }
   0xe   : > { %p523_p9 = pneg %p833_p8  ;;  %s764_s30 = smov 8  }
   0xf   : > { %s765_s4 = smov [#allocation7]   ;;  %s846_s6 = sadd.s32 1, %s760_s15  }
  0x10   : > { %p524_p10 = pnand %p523_p9, %p41_p1  ;;  %s146_s5 = sshll.u32 %s765_s4, 4  ;;  %s147_s5 = int_to_ptr.vmem [resolvable:$true] %s146_s5 }
  0x11   : > { %s27_s7 = sadd.s32 1, %s756_s14  ;;  %s24_s8 = ssub.s32 %s760_s15, %s846_s6 }
  0x12   : > { %526 = dma.hbm_to_vmem [thread:$0]  (!%p524_p10), %s131_s22, 512, %s133_s25, [#allocation6], %s763_s29, %s763_s29, %s764_s30  }
  0x13   : > { %529 = dma.hbm_to_vmem [thread:$0]  (!%p524_p10), %s145_s28, 512, %s147_s5, [#allocation6], %s763_s29, %s763_s29, %s764_s30  }
  0x14   : > { %p34_p12 = scmp.ne.s32.totalorder %s756_s14, %s752_s13  ;;  %p25_p13 = scmp.eq.s32.totalorder %s24_s8, 0 }
  0x15   : > { %p35_p0 = scmp.eq.s32.totalorder %s760_s15, 0  ;;  %p540_p5 = scmp.lt.s32.totalorder %s760_s15, 2 }
  0x16   : > { %p856_p3 = por %p106_p2, %p34_p12  ;;  %s160_s11 = sand.u32 1, %s756_s14  }
  0x17   : > { %s862_s10 = scalar_select %p25_p13, %s756_s14, %s27_s7  }
  0x18   : > { %p36_p7 = por %p35_p0, %p34_p12  ;;  %s496_s17 = sshll.u32 %s160_s11, 6 }
  0x19   : > { %s509_s20 = sshll.u32 %s760_s15, 6  ;;  %s164_s25 = scalar_lea.vmem [#allocation2], %s496_s17 }
  0x1a   : > { %s169_s24 = scalar_lea.hbm %s993_s0, %s509_s20  ;;  %s172_s26 = sshll.u32 %s164_s25, 4  ;;  %s173_s26 = int_to_ptr.vmem [resolvable:$true] %s172_s26 }
  0x1b   : > { %s170_s27 = sshll.u32 %s169_s24, 4  ;;  %p869_p2 = pnand %p540_p5, %p36_p7  ;;  %s171_s27 = int_to_ptr.hbm [resolvable:$true] %s170_s27 }
  0x1c   : > { %s161_s29 = scalar_lea.sflag [#allocation3], %s160_s11  ;;  %s660_s30 = sshra.s32 %s171_s27, 4  ;;  %s661_s30 = int_to_ptr.hbm [resolvable:$true] %s660_s30 }
  0x1d   : > { %s662_s4 = scalar_lea.hbm %s661_s30, 64  ;;  %p664_p10 = pneg %p869_p2 }
  0x1e   : > { %p663_p9 = scmp.ne.s32.totalorder %s661_s30, %s662_s4  ;;  %s667_s8 = scalar_lea.hbm %s993_s0, 128 }
  0x1f   : > { %p668_p0 = scmp.lt.s32.totalorder %s661_s30, %s993_s0  ;;  %p669_p5 = scmp.lt.s32.totalorder %s667_s8, %s662_s4 }
  0x20   : > { %p665_p12 = pnand %p664_p10, %p663_p9 }
  0x21   : > { %p670_p7 = por %p669_p5, %p668_p0 }
  0x22   : > { %p666_p13 = pneg %p665_p12 }
  0x24   : > { %p671_p11 = pnand %p670_p7, %p666_p13 }
  0x26   : > { %674 = shalt.err (!%p671_p11)
}
  0x27   : > { %s766_s11 = smov 256   ;;  %s767_s21 = smov 16  }
  0x28   : > { %533 = dma.hbm_to_vmem [thread:$0]  (!%p869_p2), %s171_s27, 1024, %s173_s26, %s161_s29, %s766_s11, %s766_s11, %s767_s21  }
  0x29   : > { %184 = sbr.rel (%p833_p8) target bundleno = 368 (0x170), region = 32  ;;  %s886_s22 = sand.u32 (!%p833_p8), 1, %s752_s13  }
  0x2a   : > { %s500_s24 = sshll.u32 (!%p833_p8), %s886_s22, 6  ;;  %s187_s25 = scalar_lea.sflag (!%p833_p8), [#allocation3], %s886_s22 }
  0x2b   : > { %s190_s30 = scalar_lea.vmem (!%p833_p8), [#allocation2], %s500_s24 }
  0x2e   : > { %735 = dma.done.wait (%p820_p4), %s187_s25, 1024  }
  0x2f   : > { %737 = vsyncadd (%p820_p4), %s187_s25, 4294966272 }
  0x30   : > { %739 = dma.done.wait (%p41_p1), [#allocation6], 1024  }
  0x31   : > { %741 = vsyncadd (%p41_p1), [#allocation6], 4294966272  ;;  %v900_v0 = vld [vmem:[%s190_s30] sm:$0xff]  ;;  %v902_v1 = vld [vmem:[%s190_s30 + $0x8] sm:$0xff]  ;;  %vm260_vm0 = vcmask 261120   ;;  %s942_s18 = scalar_lea.vmem [#allocation8], %s500_s24 }
  0x32   : > { %v904_v2 = vld [vmem:[%s190_s30 + $0x20] sm:$0xff]  ;;  %v232_v3 = vadd.f32 %v902_v1, %v900_v0  ;;  %v908_v4 = vld [vmem:[%s190_s30 + $0x28] sm:$0xff]  ;;  %v912_v6 = vld [vmem:[%s190_s30 + $0x10] sm:$0xff]  ;;  %s510_s23 = sshll.u32 %s811_s16, 6  ;;  %s396_s28 = sshll.u32 %s942_s18, 4  ;;  %s397_s28 = int_to_ptr.vmem [resolvable:$true] %s396_s28 }
  0x33   : > { %v238_v5 = vadd.f32 %v908_v4, %v904_v2  ;;  %v914_v7 = vld [vmem:[%s190_s30 + $0x18] sm:$0xff]  ;;  %v916_v8 = vld [vmem:[%s190_s30 + $0x30] sm:$0xff]  ;;  %v248_v15 = vld [vmem:[#allocation5] sm:$0xff]  ;;  %s395_s16 = scalar_lea.hbm %s996_s3, %s510_s23  ;;  %s384_s4 = scalar_lea.sflag [#allocation4], %s886_s22 }
  0x34   : > { %233 = vadd.xlane.f32.xlu0 %v232_v3  ;;  %v918_v9 = vld [vmem:[%s190_s30 + $0x38] sm:$0xff]  ;;  %v235_v10 = vadd.f32 %v914_v7, %v912_v6  ;;  %v250_v17 = vld [vmem:[#allocation5 + $0x10] sm:$0xff]  ;;  %v249_v18 = vld [vmem:[#allocation5 + $0x8] sm:$0xff]  ;;  %s398_s29 = sshll.u32 %s395_s16, 4  ;;  %s710_s20 = scalar_lea.hbm %s996_s3, 128  ;;  %s399_s29 = int_to_ptr.hbm [resolvable:$true] %s398_s29 }
  0x35   : > { %239 = vadd.xlane.f32.xlu1 %v238_v5  ;;  %v241_v11 = vadd.f32 %v918_v9, %v916_v8  ;;  %v251_v22 = vld [vmem:[#allocation5 + $0x18] sm:$0xff]  ;;  %v254_v42 = vld [vmem:[#allocation7 + $0x10] sm:$0xff]  ;;  %v252_v43 = vld [vmem:[#allocation7] sm:$0xff]  ;;  %s704_s5 = sshra.s32 %s399_s29, 4  ;;  %s705_s5 = int_to_ptr.hbm [resolvable:$true] %s704_s5 }
  0x36   : > { %v255_v41 = vld [vmem:[#allocation7 + $0x18] sm:$0xff]  ;;  %v253_v51 = vld [vmem:[#allocation7 + $0x8] sm:$0xff]  ;;  %s706_s7 = scalar_lea.hbm %s705_s5, 64  ;;  %p711_p11 = scmp.lt.s32.totalorder %s705_s5, %s996_s3 }
  0x37   : > { %p707_p1 = scmp.ne.s32.totalorder %s705_s5, %s706_s7  ;;  %p712_p2 = scmp.lt.s32.totalorder %s710_s20, %s706_s7 }
  0x39   : > { %p708_p4 = pnand %p707_p1, %p856_p3  ;;  %p713_p9 = por %p712_p2, %p711_p11 }
  0x3b   : > { %p709_p8 = pneg %p708_p4 }
  0x3c   : > { %236 = vadd.xlane.f32.xlu0 %v235_v10 }
  0x3d   : > { %242 = vadd.xlane.f32.xlu1 %v241_v11  ;;  %p714_p10 = pnand %p713_p9, %p709_p8 }
  0xa7   : > { %v234_v12 = vpop.xlane.xlu0 %233 }
  0xa8   : > { %v240_v13 = vpop.xlane.xlu1 %239  ;;  %v244_v14 = vmul.f32 0.00390625, %v234_v12 }
  0xa9   : > { %v246_v16 = vmul.f32 0.00390625, %v240_v13 }
  0xaa   : > { %v256_v20 = vmul.f32 %v248_v15, %v244_v14 }
  0xab   : > { %v258_v25 = vmul.f32 %v250_v17, %v246_v16 }
  0xac   : > { %v261_v28 = vsel %vm260_vm0, %v256_v20, 0.0 }
  0xad   : > { %v264_v31 = vsel %vm260_vm0, %v258_v25, 0.0 }
  0xaf   : > { %v237_v19 = vpop.xlane.xlu0 %236 }
  0xb0   : > { %v245_v21 = vmul.f32 0.00390625, %v237_v19  ;;  %v243_v23 = vpop.xlane.xlu1 %242 }
  0xb1   : > { %v247_v24 = vmul.f32 0.00390625, %v243_v23 }
  0xb2   : > { %v257_v26 = vmul.f32 %v249_v18, %v245_v21 }
  0xb3   : > { %v259_v27 = vmul.f32 %v251_v22, %v247_v24 }
  0xb4   : > { %v262_v29 = vsel %vm260_vm0, %v257_v26, 0.0 }
  0xb5   : > { %v263_v30 = vadd.f32 %v262_v29, %v261_v28  ;;  %v266_v32 = vsel %vm260_vm0, %v259_v27, 0.0 }
  0xb7   : > { %v265_v33 = vadd.f32 %v264_v31, %v263_v30 }
  0xb9   : > { %v267_v34 = vadd.f32 %v266_v32, %v265_v33 }
  0xbb   : > { %v268_v35 = vrot.slane %v267_v34, 4 }
  0xbd   : > { %v269_v36 = vadd.f32 %v268_v35, %v267_v34 }
  0xbf   : > { %v270_v37 = vrot.slane %v269_v36, 2 }
  0xc1   : > { %v271_v38 = vadd.f32 %v270_v37, %v269_v36 }
  0xc3   : > { %v272_v39 = vrot.slane %v271_v38, 1 }
  0xc5   : > { %v273_v40 = vadd.f32 %v272_v39, %v271_v38 }
  0xc7   : > { %v274_v44 = vmax.f32 %v273_v40, 0.0 }
  0xc9   : > { %v278_v45 = vmul.f32 %v274_v44, %v255_v41  ;;  %v277_v46 = vmul.f32 %v274_v44, %v254_v42  ;;  %v275_v47 = vmul.f32 %v274_v44, %v252_v43  ;;  %v276_v52 = vmul.f32 %v274_v44, %v253_v51 }
  0xcb   : > { %v288_v48 = vsel %vm260_vm0, %v278_v45, 0.0  ;;  %v285_v49 = vsel %vm260_vm0, %v277_v46, 0.0  ;;  %v279_v50 = vsel %vm260_vm0, %v275_v47, 0.0  ;;  %v282_v53 = vsel %vm260_vm0, %v276_v52, 0.0 }
  0xcc   : > { %289 = vadd.xlane.f32.xlu1 %v288_v48  ;;  %286 = vadd.xlane.f32.xlu0 %v285_v49 }
  0xcd   : > { %280 = vadd.xlane.f32.xlu2 %v279_v50 }
  0xd5   : > { %283 = vadd.xlane.f32.xlu2 %v282_v53 }
 0x13f   : > { %v290_v54 = vpop.xlane.xlu1 %289  ;;  %v287_v55 = vpop.xlane.xlu0 %286 }
 0x140   : > { %v294_v56 = vsub.f32 0.0, %v290_v54  ;;  %v293_v57 = vsub.f32 0.0, %v287_v55  ;;  %v281_v58 = vpop.xlane.xlu2 %280 }
 0x141   : > { %v291_v59 = vsub.f32 0.0, %v281_v58 }
 0x142   : > { %v301_v60 = vmul.f32 1.442695, %v294_v56  ;;  %v299_v61 = vmul.f32 1.442695, %v293_v57 }
 0x143   : > { %v295_v62 = vmul.f32 1.442695, %v291_v59 }
 0x144   : > { %584 = vpow2.f32 %v301_v60 }
 0x145   : > { %586 = vpow2.f32 %v299_v61 }
 0x146   : > { %588 = vpow2.f32 %v295_v62 }
 0x148   : > { %v284_v63 = vpop.xlane.xlu2 %283 }
 0x149   : > { %v292_v3 = vsub.f32 0.0, %v284_v63 }
 0x14a   : > { %v585_v5 = vpop.eup %584 }
 0x14b   : > { %v587_v10 = vpop.eup %586  ;;  %v306_v11 = vadd.f32 1.0, %v585_v5  ;;  %v297_v12 = vmul.f32 1.442695, %v292_v3 }
 0x14c   : > { %v589_v13 = vpop.eup %588  ;;  %v305_v14 = vadd.f32 1.0, %v587_v10 }
 0x14d   : > { %590 = vrcp.f32 %v306_v11  ;;  %v303_v15 = vadd.f32 1.0, %v589_v13  ;;  %v361_v22 = vand.u32 2147483647, %v306_v11  ;;  %v363_v25 = vand.u32 2147483648, %v306_v11 }
 0x14e   : > { %592 = vrcp.f32 %v305_v14  ;;  %v348_v27 = vand.u32 2147483648, %v305_v14  ;;  %vm357_vm2 = vweird.f32 %v306_v11  ;;  %v346_v31 = vand.u32 2147483647, %v305_v14 }
 0x14f   : > { %594 = vpow2.f32 %v297_v12  ;;  %vm362_vm4 = vcmp.eq.f32.partialorder %v361_v22, 8.507059e+37  ;;  %vm342_vm5 = vweird.f32 %v305_v14  ;;  %v364_v34 = vor.u32 1.1754944e-38, %v363_v25 }
 0x150   : > { %596 = vrcp.f32 %v303_v15  ;;  %v349_v36 = vor.u32 1.1754944e-38, %v348_v27  ;;  %v318_v37 = vand.u32 2147483648, %v303_v15  ;;  %v316_v40 = vand.u32 2147483647, %v303_v15 }
 0x151   : > { %vm347_vm9 = vcmp.eq.f32.partialorder %v346_v31, 8.507059e+37  ;;  %vm312_vm10 = vweird.f32 %v303_v15 }
 0x152   : > { %v319_v50 = vor.u32 1.1754944e-38, %v318_v37  ;;  %vm317_vm12 = vcmp.eq.f32.partialorder %v316_v40, 8.507059e+37 }
 0x153   : > { %v591_v16 = vpop.eup %590 }
 0x154   : > { %v593_v17 = vpop.eup %592  ;;  %v353_v18 = vmul.f32 %v591_v16, %v306_v11  ;;  %vm358_vm1 = vweird.f32 %v591_v16 }
 0x155   : > { %v595_v19 = vpop.eup %594  ;;  %v338_v20 = vmul.f32 %v593_v17, %v305_v14  ;;  %vm343_vm3 = vweird.f32 %v593_v17  ;;  %vm359_vm6 = vmor %vm357_vm2, %vm358_vm1 }
 0x156   : > { %v354_v21 = vsub.f32 1.0, %v353_v18  ;;  %v932_v23 = vadd.f32 1.0, %v595_v19  ;;  %v597_v24 = vpop.eup %596  ;;  %vm344_vm7 = vmor %vm342_vm5, %vm343_vm3 }
 0x157   : > { %v339_v26 = vsub.f32 1.0, %v338_v20  ;;  %v308_v29 = vmul.f32 %v597_v24, %v303_v15  ;;  %vm313_vm8 = vweird.f32 %v597_v24 }
 0x158   : > { %v355_v28 = vmul.f32 %v591_v16, %v354_v21  ;;  %598 = vrcp.f32 %v932_v23  ;;  %vm314_vm11 = vmor %vm312_vm10, %vm313_vm8  ;;  %v333_v53 = vand.u32 2147483648, %v932_v23  ;;  %v331_v55 = vand.u32 2147483647, %v932_v23 }
 0x159   : > { %v340_v30 = vmul.f32 %v593_v17, %v339_v26  ;;  %v309_v33 = vsub.f32 1.0, %v308_v29  ;;  %vm327_vm14 = vweird.f32 %v932_v23 }
 0x15a   : > { %v356_v32 = vadd.f32 %v591_v16, %v355_v28  ;;  %vm332_vm0 = vcmp.eq.f32.partialorder %v331_v55, 8.507059e+37 }
 0x15b   : > { %v341_v35 = vadd.f32 %v593_v17, %v340_v30  ;;  %v310_v39 = vmul.f32 %v597_v24, %v309_v33 }
 0x15c   : > { %v360_v38 = vsel %vm359_vm6, %v591_v16, %v356_v32 }
 0x15d   : > { %v365_v41 = vsel %vm362_vm4, %v364_v34, %v360_v38  ;;  %v345_v42 = vsel %vm344_vm7, %v593_v17, %v341_v35  ;;  %v311_v47 = vadd.f32 %v597_v24, %v310_v39 }
 0x15e   : > { %v599_v43 = vpop.eup %598  ;;  %v373_v44 = vmul.f32 %v365_v41, %v916_v8  ;;  %v374_v45 = vmul.f32 %v365_v41, %v918_v9  ;;  %v350_v46 = vsel %vm347_vm9, %v349_v36, %v345_v42 }
 0x15f   : > { %v371_v48 = vmul.f32 %v350_v46, %v904_v2  ;;  %v372_v49 = vmul.f32 %v350_v46, %v908_v4  ;;  %v323_v51 = vmul.f32 %v599_v43, %v932_v23  ;;  %v315_v8 = vsel %vm314_vm11, %v597_v24, %v311_v47 }
 0x160   : > { %381 = vst [vmem:[%s942_s18 + $0x30] sm:$0xff] %v373_v44  ;;  %v320_v2 = vsel %vm317_vm12, %v319_v50, %v315_v8  ;;  %vm328_vm13 = vweird.f32 %v599_v43 }
 0x161   : > { %382 = vst [vmem:[%s942_s18 + $0x38] sm:$0xff] %v374_v45  ;;  %v324_v4 = vsub.f32 1.0, %v323_v51  ;;  %v367_v9 = vmul.f32 %v320_v2, %v900_v0  ;;  %v368_v52 = vmul.f32 %v320_v2, %v902_v1  ;;  %vm329_vm15 = vmor %vm327_vm14, %vm328_vm13  ;;  %v334_v0 = vor.u32 1.1754944e-38, %v333_v53 }
 0x162   : > { %379 = vst [vmem:[%s942_s18 + $0x20] sm:$0xff] %v371_v48 }
 0x163   : > { %380 = vst [vmem:[%s942_s18 + $0x28] sm:$0xff] %v372_v49  ;;  %v325_v54 = vmul.f32 %v599_v43, %v324_v4 }
 0x164   : > { %375 = vst [vmem:[%s942_s18] sm:$0xff] %v367_v9 }
 0x165   : > { %376 = vst [vmem:[%s942_s18 + $0x8] sm:$0xff] %v368_v52  ;;  %v326_v56 = vadd.f32 %v599_v43, %v325_v54 }
 0x167   : > { %v330_v1 = vsel %vm329_vm15, %v599_v43, %v326_v56 }
 0x168   : > { %v335_v57 = vsel %vm332_vm0, %v334_v0, %v330_v1 }
 0x169   : > { %v369_v58 = vmul.f32 %v335_v57, %v912_v6  ;;  %v370_v59 = vmul.f32 %v335_v57, %v914_v7 }
 0x16b   : > { %377 = vst [vmem:[%s942_s18 + $0x10] sm:$0xff] %v369_v58 }
 0x16c   : > { %378 = vst [vmem:[%s942_s18 + $0x18] sm:$0xff] %v370_v59 }
 0x16d   : > { %717 = shalt.err (!%p714_p10)
}
 0x16e   : > { %s768_s22 = smov 256   ;;  %s769_s24 = smov 16  }
 0x16f   : > { %521 = dma.vmem_to_hbm [thread:$0]  (%p856_p3), %s397_s28, 1024, %s399_s29, %s384_s4, %s768_s22, %s768_s22, %s769_s24  }
 0x170 PF: > { %s413_s25 = sand.u32 1, %s748_s12   ;;  %p1002_p12 = scmp.ge.s32.totalorder %s760_s15, 2 }
 0x171   : > { %s414_s30 = scalar_lea.sflag [#allocation4], %s413_s25 }
 0x172   : > { %p535_p13 = pnand %p1002_p12, %p825_p6 }
 0x174   : > { %p536_p0 = pneg %p535_p13 }
 0x176   : > { %743 = dma.done.wait (%p536_p0), %s414_s30, 1024  }
 0x177   : > { %745 = vsyncadd (%p536_p0), %s414_s30, 4294966272  ;;  %p17_p5 = scmp.ge.s32.totalorder %s846_s6, 4   ;;  %s1003_s12 = smov %s752_s13 }
 0x178   : > { %s1004_s13 = smov %s756_s14  ;;  %s1005_s14 = smov %s862_s10 }
 0x179   : > { %s1006_s15 = smov %s846_s6  ;;  %19 = sbr.rel (!%p17_p5) target bundleno = 6 (0x6), region = 85 }
 0x17e   :  { %420 = vsyncpa [#allocation3], 1 }
 0x17f   :  { %422 = vsyncpa [#allocation3 + $0x1], 1 }
 0x180   :  { %423 = vsyncpa [#allocation6], 1 }
 0x181   :  { %424 = vsyncpa [#allocation4], 1 }
 0x182   :  { %426 = vsyncpa [#allocation4 + $0x1], 1 }

</bundles_post_ra>
